<compile_context>
chip_gen: v7x
topology: tpu7x:2x2x1
jax: 0.10.0
libtpu: 0.0.40
codegen_flags: <defaults>
</compile_context>

<pallas_src>
import functools

import jax
import jax.numpy as jnp
from jax import lax
from jax.experimental import pallas as pl
from jax.experimental.pallas import tpu as pltpu


# ----------------------------------------------------------------------------
# Kernel
# ----------------------------------------------------------------------------
def _ce_kernel(logits_ref, targets_ref, out_ref, m_ref, l_ref, t_ref,
               *, n_rows, n_cols, block_rows, block_c,
               mask_cols, mask_rows, exp_dtype):
    """Cross-entropy with online logsumexp.

    grid = (row_blocks [parallel], class_blocks [arbitrary, reduction last])
      logits_ref : (block_rows, block_c)   input dtype (upcast in-register)
      targets_ref: (block_rows, 1)         int32
      out_ref    : (1, 8, 128)             per-row-block partial loss sum
      m_ref/l_ref/t_ref : (block_rows, 1)  f32 running max / sum-exp / tgt logit
    """
    i = pl.program_id(0)           # batch (row) block — parallel
    j = pl.program_id(1)           # class block       — reduction (last axis)
    nj = pl.num_programs(1)

    @pl.when(j == 0)
    def _():
        m_ref[...] = jnp.full_like(m_ref, -jnp.inf)
        l_ref[...] = jnp.zeros_like(l_ref)
        t_ref[...] = jnp.zeros_like(t_ref)

    x = logits_ref[...].astype(jnp.float32)                  # in-register upcast
    tgt = targets_ref[...]                                    # (br, 1) int32

    # Global class index of each element (needed for the target compare).
    col = j * block_c + lax.broadcasted_iota(jnp.int32, x.shape, 1)
    if mask_cols:
        # Partial last class block: pad with a large-negative FINITE value
        # (-inf would give inf-inf = NaN in the online max update).
        x = jnp.where(col < n_cols, x, jnp.float32(-1e30))

    # Online (numerically stable) logsumexp update.
    m_old = m_ref[...]
    m_new = jnp.maximum(m_old, jnp.max(x, axis=-1, keepdims=True))
    alpha = jnp.exp(m_old - m_new)                            # 0 on first block
    e = x - m_new
    if exp_dtype != jnp.float32:
        # Optional EUP relief (v6e/v7x only); never on v5e (no bf16 EUP).
        e = e.astype(exp_dtype)
    l_ref[...] = alpha * l_ref[...] + jnp.sum(
        jnp.exp(e).astype(jnp.float32), axis=-1, keepdims=True)
    m_ref[...] = m_new

    # Accumulate the target logit (col == tgt only matches valid classes).
    t_ref[...] += jnp.sum(jnp.where(col == tgt, x, 0.0), axis=-1, keepdims=True)

    @pl.when(j == nj - 1)
    def _():
        loss = m_ref[...] + jnp.log(l_ref[...]) - t_ref[...]  # (br, 1)
        if mask_rows:
            # Partial last row block: discard padded rows (select, not
            # multiply — padded rows may carry garbage/NaN from the OOB DMA).
            row = i * block_rows + lax.broadcasted_iota(jnp.int32, loss.shape, 0)
            loss = jnp.where(row < n_rows, loss, 0.0)
        total = jnp.sum(loss, axis=0, keepdims=True)          # (1, 1)
        out_ref[0] = jnp.broadcast_to(total, (8, 128))        # lane-dense write


# ----------------------------------------------------------------------------
# Block sizing / VMEM budgets
# ----------------------------------------------------------------------------
def _vmem_budgets():
    """(logits tile budget, scoped-VMEM limit) in bytes, per chip generation."""
    limit = 48 << 20                       # conservative: fits v7x's 64 MiB/TC
    try:
        kind = jax.devices()[0].device_kind.lower()
    except Exception:
        kind = ""
    big_vmem = any(t in kind for t in ("v5 lite", "v5e", "v5lite", "v6"))
    if not big_vmem:
        try:
            big_vmem = pltpu.get_tpu_info().vmem_capacity_bytes >= (128 << 20)
        except Exception:
            big_vmem = False
    if big_vmem:
        limit = 64 << 20                   # v5e / v6e: 128 MiB physical VMEM
    return limit // 2, limit


def _choose_blocks(n, c, itemsize, tile_budget):
    """Pick (block_rows, block_c) under the VMEM tile budget."""
    row_align = 16 if itemsize < 4 else 8          # bf16 needs (16,128) tiles
    lane = 128
    # Cost per logits element: double-buffered input tile + ~2 fused f32
    # temporaries (Mosaic fuses the upcast/mask/exp/reduce chain vreg-wise).
    per_elem = 2 * itemsize + 2 * 4
    # Lane-padded per-row fixed cost: 3x (br,1)->(br,128) f32 scratch (m/l/t)
    # + double-buffered (br,1)->(br,128) i32 targets tile.
    per_row_fixed = (3 + 2) * lane * 4
    n_aligned = ((n + row_align - 1) // row_align) * row_align

    # Preferred: keep the whole class axis resident -> single reduction step,
    # no online-LSE scaffolding traffic, one contiguous DMA per row block.
    rows = tile_budget // (c * per_elem + per_row_fixed)
    rows = (rows // row_align) * row_align
    if rows >= row_align:
        block_rows = min(rows, 1024, n_aligned)
        # Prefer >= 2 row blocks (megacore sharding on multi-TC chips) as
        # long as each step still streams a few MiB of logits.
        if block_rows >= n_aligned and n_aligned > row_align:
            half = ((n_aligned // 2 + row_align - 1) // row_align) * row_align
            if half * c * itemsize >= (2 << 20):
                block_rows = half
        return block_rows, c

    # Class axis too large for the budget: tile it (multiple of 128).  Keep a
    # moderate row block and give the rest of the budget to block_c (fewer
    # reduction steps, longer contiguous runs in the strided DMA).  The
    # wrapper uses 3 logits buffers in this regime, so charge 3 here.
    per_elem = 3 * itemsize + 2 * 4
    block_rows = min(n_aligned, max(row_align, 64))
    block_c = (tile_budget - block_rows * per_row_fixed) // (block_rows * per_elem)
    block_c = max(lane, (block_c // lane) * lane)
    return block_rows, min(block_c, (c // lane) * lane)


def _logits_spec(block_rows, block_c, n_buffers):
    idx_map = lambda i, j: (i, j)
    if n_buffers > 2 and hasattr(pl, "Buffered"):
        try:
            return pl.BlockSpec((block_rows, block_c), idx_map,
                                pipeline_mode=pl.Buffered(n_buffers))
        except TypeError:
            pass   # older jax: BlockSpec has no pipeline_mode kwarg
    return pl.BlockSpec((block_rows, block_c), idx_map)


# ----------------------------------------------------------------------------
# Wrapper
# ----------------------------------------------------------------------------
def cross_entropy_loss(logits, targets, *, block_rows=None, block_c=None,
                       bf16_exp=False):
    """Mean cross-entropy, semantics of nn.CrossEntropyLoss()(logits, targets).

    logits:  [N, C] float (f32 or bf16 — upcast in-register inside the kernel)
    targets: [N]    int class indices
    returns: scalar float32
    """
    n, c = logits.shape
    itemsize = jnp.dtype(logits.dtype).itemsize
    row_align = 16 if itemsize < 4 else 8
    tile_budget, vmem_limit = _vmem_budgets()

    br_auto, bc_auto = _choose_blocks(n, c, itemsize, tile_budget)
    if block_rows is None:
        block_rows = br_auto
    else:                                   # sanitize overrides ((8,128) rule)
        block_rows = max(row_align, (block_rows // row_align) * row_align)
    if block_c is None:
        block_c = bc_auto
    else:
        block_c = c if block_c >= c else max(128, (block_c // 128) * 128)

    g_rows = pl.cdiv(n, block_rows)
    g_cols = pl.cdiv(c, block_c)
    n_buffers = 3 if g_cols > 1 else 2       # deeper pipeline for strided DMA
    targets2d = targets.astype(jnp.int32).reshape(n, 1)

    kernel = functools.partial(
        _ce_kernel,
        n_rows=n, n_cols=c, block_rows=block_rows, block_c=block_c,
        mask_cols=(c % block_c) != 0,
        mask_rows=(n % block_rows) != 0,
        exp_dtype=jnp.bfloat16 if bf16_exp else jnp.float32,
    )

    partial = pl.pallas_call(
        kernel,
        out_shape=jax.ShapeDtypeStruct((g_rows, 8, 128), jnp.float32),
        grid_spec=pltpu.PrefetchScalarGridSpec(
            num_scalar_prefetch=0,
            grid=(g_rows, g_cols),
            in_specs=[
                _logits_spec(block_rows, block_c, n_buffers),
                pl.BlockSpec((block_rows, 1), lambda i, j: (i, 0)),
            ],
            out_specs=pl.BlockSpec((1, 8, 128), lambda i, j: (i, 0, 0)),
            scratch_shapes=[pltpu.VMEM((block_rows, 1), jnp.float32)] * 3,
        ),
        compiler_params=pltpu.CompilerParams(
            # Row axis parallel (megacore-shardable on multi-TC chips),
            # class axis is the reduction and stays last / arbitrary.
            dimension_semantics=("parallel", "arbitrary"),
            vmem_limit_bytes=vmem_limit,
        ),
    )(logits, targets2d)

    # Final reduction of per-row-block partial sums (cheap, done in XLA).
    return jnp.sum(partial[:, 0, 0]) / jnp.float32(n)


class BaseNetPallas:
    """JAX/Pallas mirror of BaseNet: abstract forward + CE loss kernel."""

    def __init__(self, cfg=None):
        self.cfg = cfg  # BaseNet holds no learnable parameters

    def forward(self, x):
        raise NotImplementedError("Subclass must implement forward method")

    def compute_loss(self, output, target):
        return cross_entropy_loss(output, target)

    def get_learnable_parameters(self):
        return []  # no parameters on the base class


# ----------------------------------------------------------------------------
# Self-test
# ----------------------------------------------------------------------------
def _ref_ce(logits, targets):
    lf = logits.astype(jnp.float32)
    lse = jax.scipy.special.logsumexp(lf, axis=-1)
    picked = jnp.take_along_axis(lf, targets[:, None].astype(jnp.int32),
                                 axis=-1)[:, 0]
    return jnp.mean(lse - picked)


if __name__ == "__main__":
    key = jax.random.PRNGKey(0)
    net = BaseNetPallas(cfg={})

    # Test 1: f32, aligned shapes, auto block sizes (single class block).
    k1, k2, key = jax.random.split(key, 3)
    n, c = 16, 128
    logits = jax.random.normal(k1, (n, c), dtype=jnp.float32)
    targets = jax.random.randint(k2, (n,), 0, c, dtype=jnp.int32)
    loss = jax.block_until_ready(net.compute_loss(logits, targets))
    ref = _ref_ce(logits, targets)
    assert jnp.allclose(loss, ref, atol=1e-4, rtol=1e-4), (loss, ref)

    # Test 2: ragged batch (N=20) + class tiling (C=256, block_c=128) —
    # exercises row masking, multiple parallel row blocks, online logsumexp
    # and the deeper (Buffered(3)) logits pipeline.
    k1, k2, key = jax.random.split(key, 3)
    n, c = 20, 256
    logits = jax.random.normal(k1, (n, c), dtype=jnp.float32) * 3.0
    targets = jax.random.randint(k2, (n,), 0, c, dtype=jnp.int32)
    loss = jax.block_until_ready(
        cross_entropy_loss(logits, targets, block_rows=8, block_c=128))
    ref = _ref_ce(logits, targets)
    assert jnp.allclose(loss, ref, atol=1e-4, rtol=1e-4), (loss, ref)

    # Test 3: bf16 logits streamed in their narrow dtype (16-row alignment).
    k1, k2, key = jax.random.split(key, 3)
    n, c = 32, 128
    logits = jax.random.normal(k1, (n, c), dtype=jnp.float32).astype(jnp.bfloat16)
    targets = jax.random.randint(k2, (n,), 0, c, dtype=jnp.int32)
    loss = jax.block_until_ready(net.compute_loss(logits, targets))
    ref = _ref_ce(logits, targets)
    assert jnp.allclose(loss, ref, atol=1e-3, rtol=1e-3), (loss, ref)

    # Test 4: non-multiple class count (C=200) with class tiling — partial
    # last class block exercises the -1e30 column mask path.
    k1, k2, key = jax.random.split(key, 3)
    n, c = 24, 200
    logits = jax.random.normal(k1, (n, c), dtype=jnp.float32)
    targets = jax.random.randint(k2, (n,), 0, c, dtype=jnp.int32)
    loss = jax.block_until_ready(
        cross_entropy_loss(logits, targets, block_rows=8, block_c=128))
    ref = _ref_ce(logits, targets)
    assert jnp.allclose(loss, ref, atol=1e-4, rtol=1e-4), (loss, ref)

    print("KERNEL_OK")
</pallas_src>

<mosaic_0001>
module attributes {stable_mosaic.version = 11 : i64} {
  func.func @_ce_kernel(%arg0: i32, %arg1: i32, %arg2: memref<16x128xf32, #tpu.memory_space<vmem>>, %arg3: memref<16x1xi32, #tpu.memory_space<vmem>>, %arg4: memref<1x8x128xf32, #tpu.memory_space<vmem>>, %arg5: memref<16x1xf32, #tpu.memory_space<vmem>>, %arg6: memref<16x1xf32, #tpu.memory_space<vmem>>, %arg7: memref<16x1xf32, #tpu.memory_space<vmem>>) attributes {dimension_semantics = [#tpu.dimension_semantics<parallel>, #tpu.dimension_semantics<arbitrary>], iteration_bounds = array<i64: 1, 1>, scalar_prefetch = 0 : i64, scratch_operands = 3 : i64, tpu.core_type = #tpu.core_type<tc>, window_params = [{transform_indices = @transform_0, window_bounds = array<i64: 16, 128>}, {transform_indices = @transform_1, window_bounds = array<i64: 16, 1>}, {transform_indices = @transform_2, window_bounds = array<i64: 1, 8, 128>}]} {
    %c0_i32 = arith.constant 0 : i32
    %0 = arith.cmpi eq, %arg1, %c0_i32 : i32
    %1 = arith.extui %0 : i1 to i32
    %c0_i32_0 = arith.constant 0 : i32
    %2 = arith.cmpi ne, %1, %c0_i32_0 : i32
    scf.if %2 {
      %cst_21 = arith.constant 0xFF800000 : f32
      %37 = vector.broadcast %cst_21 : f32 to vector<16x1xf32>
      %c0_22 = arith.constant 0 : index
      %c0_23 = arith.constant 0 : index
      %38 = vector.load %arg5[%c0_22, %c0_23] : memref<16x1xf32, #tpu.memory_space<vmem>>, vector<16x1xf32>
      tpu.vector_store %arg5[%c0_22, %c0_23], %37 {strides = array<i32>} : memref<16x1xf32, #tpu.memory_space<vmem>>, vector<16x1xf32>,
      %cst_24 = arith.constant 0.000000e+00 : f32
      %39 = vector.broadcast %cst_24 : f32 to vector<16x1xf32>
      %c0_25 = arith.constant 0 : index
      %c0_26 = arith.constant 0 : index
      %40 = vector.load %arg6[%c0_25, %c0_26] : memref<16x1xf32, #tpu.memory_space<vmem>>, vector<16x1xf32>
      tpu.vector_store %arg6[%c0_25, %c0_26], %39 {strides = array<i32>} : memref<16x1xf32, #tpu.memory_space<vmem>>, vector<16x1xf32>,
      %cst_27 = arith.constant 0.000000e+00 : f32
      %41 = vector.broadcast %cst_27 : f32 to vector<16x1xf32>
      %c0_28 = arith.constant 0 : index
      %c0_29 = arith.constant 0 : index
      %42 = vector.load %arg7[%c0_28, %c0_29] : memref<16x1xf32, #tpu.memory_space<vmem>>, vector<16x1xf32>
      tpu.vector_store %arg7[%c0_28, %c0_29], %41 {strides = array<i32>} : memref<16x1xf32, #tpu.memory_space<vmem>>, vector<16x1xf32>,
    } else {
    }
    %c0 = arith.constant 0 : index
    %c0_1 = arith.constant 0 : index
    %3 = vector.load %arg2[%c0, %c0_1] : memref<16x128xf32, #tpu.memory_space<vmem>>, vector<16x128xf32>
    %c0_2 = arith.constant 0 : index
    %c0_3 = arith.constant 0 : index
    %4 = vector.load %arg3[%c0_2, %c0_3] : memref<16x1xi32, #tpu.memory_space<vmem>>, vector<16x1xi32>
    %c128_i32 = arith.constant 128 : i32
    %5 = arith.muli %arg1, %c128_i32 : i32
    %6 = tpu.iota {dimensions = array<i32: 1>} : vector<16x128xi32>
    %7 = vector.broadcast %5 : i32 to vector<16x128xi32>
    %8 = arith.addi %7, %6 : vector<16x128xi32>
    %c0_4 = arith.constant 0 : index
    %c0_5 = arith.constant 0 : index
    %9 = vector.load %arg5[%c0_4, %c0_5] : memref<16x1xf32, #tpu.memory_space<vmem>>, vector<16x1xf32>
    %cst = arith.constant dense<0xFF800000> : vector<16xf32>
    %10 = vector.multi_reduction <maximumf>, %3, %cst [1] : vector<16x128xf32> to vector<16xf32>
    %11 = vector.shape_cast %10 : vector<16xf32> to vector<16x1xf32>
    %12 = arith.maximumf %9, %11 : vector<16x1xf32>
    %13 = arith.subf %9, %12 : vector<16x1xf32>
    %14 = math.exp %13 : vector<16x1xf32>
    %15 = vector.broadcast %12 : vector<16x1xf32> to vector<16x128xf32>
    %16 = arith.subf %3, %15 : vector<16x128xf32>
    %c0_6 = arith.constant 0 : index
    %c0_7 = arith.constant 0 : index
    %17 = vector.load %arg6[%c0_6, %c0_7] : memref<16x1xf32, #tpu.memory_space<vmem>>, vector<16x1xf32>
    %18 = arith.mulf %14, %17 : vector<16x1xf32>
    %19 = math.exp %16 : vector<16x128xf32>
    %cst_8 = arith.constant dense<0.000000e+00> : vector<16xf32>
    %20 = vector.multi_reduction <add>, %19, %cst_8 [1] : vector<16x128xf32> to vector<16xf32>
    %21 = vector.shape_cast %20 : vector<16xf32> to vector<16x1xf32>
    %22 = arith.addf %18, %21 : vector<16x1xf32>
    %c0_9 = arith.constant 0 : index
    %c0_10 = arith.constant 0 : index
    %23 = vector.load %arg6[%c0_9, %c0_10] : memref<16x1xf32, #tpu.memory_space<vmem>>, vector<16x1xf32>
    tpu.vector_store %arg6[%c0_9, %c0_10], %22 {strides = array<i32>} : memref<16x1xf32, #tpu.memory_space<vmem>>, vector<16x1xf32>,
    %c0_11 = arith.constant 0 : index
    %c0_12 = arith.constant 0 : index
    %24 = vector.load %arg5[%c0_11, %c0_12] : memref<16x1xf32, #tpu.memory_space<vmem>>, vector<16x1xf32>
    tpu.vector_store %arg5[%c0_11, %c0_12], %12 {strides = array<i32>} : memref<16x1xf32, #tpu.memory_space<vmem>>, vector<16x1xf32>,
    %c0_13 = arith.constant 0 : index
    %c0_14 = arith.constant 0 : index
    %25 = vector.load %arg7[%c0_13, %c0_14] : memref<16x1xf32, #tpu.memory_space<vmem>>, vector<16x1xf32>
    %26 = vector.broadcast %4 : vector<16x1xi32> to vector<16x128xi32>
    %27 = arith.cmpi eq, %8, %26 : vector<16x128xi32>
    %cst_15 = arith.constant 0.000000e+00 : f32
    %28 = vector.broadcast %cst_15 : f32 to vector<16x128xf32>
    %29 = arith.select %27, %3, %28 : vector<16x128xi1>, vector<16x128xf32>
    %cst_16 = arith.constant dense<0.000000e+00> : vector<16xf32>
    %30 = vector.multi_reduction <add>, %29, %cst_16 [1] : vector<16x128xf32> to vector<16xf32>
    %31 = vector.shape_cast %30 : vector<16xf32> to vector<16x1xf32>
    %32 = arith.addf %25, %31 : vector<16x1xf32>
    %c0_17 = arith.constant 0 : index
    %c0_18 = arith.constant 0 : index
    %33 = vector.load %arg7[%c0_17, %c0_18] : memref<16x1xf32, #tpu.memory_space<vmem>>, vector<16x1xf32>
    tpu.vector_store %arg7[%c0_17, %c0_18], %32 {strides = array<i32>} : memref<16x1xf32, #tpu.memory_space<vmem>>, vector<16x1xf32>,
    %c0_i32_19 = arith.constant 0 : i32
    %34 = arith.cmpi eq, %arg1, %c0_i32_19 : i32
    %35 = arith.extui %34 : i1 to i32
    %c0_i32_20 = arith.constant 0 : i32
    %36 = arith.cmpi ne, %35, %c0_i32_20 : i32
    scf.if %36 {
      %c0_21 = arith.constant 0 : index
      %c0_22 = arith.constant 0 : index
      %37 = vector.load %arg5[%c0_21, %c0_22] : memref<16x1xf32, #tpu.memory_space<vmem>>, vector<16x1xf32>
      %c0_23 = arith.constant 0 : index
      %c0_24 = arith.constant 0 : index
      %38 = vector.load %arg6[%c0_23, %c0_24] : memref<16x1xf32, #tpu.memory_space<vmem>>, vector<16x1xf32>
      %39 = math.log %38 : vector<16x1xf32>
      %40 = arith.addf %37, %39 : vector<16x1xf32>
      %c0_25 = arith.constant 0 : index
      %c0_26 = arith.constant 0 : index
      %41 = vector.load %arg7[%c0_25, %c0_26] : memref<16x1xf32, #tpu.memory_space<vmem>>, vector<16x1xf32>
      %42 = arith.subf %40, %41 : vector<16x1xf32>
      %cst_27 = arith.constant dense<0.000000e+00> : vector<1xf32>
      %43 = vector.multi_reduction <add>, %42, %cst_27 [0] : vector<16x1xf32> to vector<1xf32>
      %44 = vector.shape_cast %43 : vector<1xf32> to vector<1x1xf32>
      %45 = vector.shape_cast %44 : vector<1x1xf32> to vector<1x1xf32>
      %46 = vector.broadcast %45 : vector<1x1xf32> to vector<8x128xf32>
      %c0_28 = arith.constant 0 : index
      %c0_29 = arith.constant 0 : index
      %c0_30 = arith.constant 0 : index
      %47 = vector.load %arg4[%c0_28, %c0_29, %c0_30] : memref<1x8x128xf32, #tpu.memory_space<vmem>>, vector<1x8x128xf32>
      %48 = vector.shape_cast %47 : vector<1x8x128xf32> to vector<8x128xf32>
      %49 = vector.shape_cast %46 : vector<8x128xf32> to vector<1x8x128xf32>
      tpu.vector_store %arg4[%c0_28, %c0_29, %c0_30], %49 {strides = array<i32>} : memref<1x8x128xf32, #tpu.memory_space<vmem>>, vector<1x8x128xf32>,
    } else {
    }
    return
  }
  func.func @transform_0(%arg0: i32, %arg1: i32) -> (i32, i32) {
    %c0_i32 = arith.constant 0 : i32
    return %arg0, %arg1 : i32, i32
  }
  func.func @transform_1(%arg0: i32, %arg1: i32) -> (i32, i32) {
    %c0_i32 = arith.constant 0 : i32
    %c0_i32_0 = arith.constant 0 : i32
    return %arg0, %c0_i32 : i32, i32
  }
  func.func @transform_2(%arg0: i32, %arg1: i32) -> (i32, i32, i32) {
    %c0_i32 = arith.constant 0 : i32
    %c0_i32_0 = arith.constant 0 : i32
    %c0_i32_1 = arith.constant 0 : i32
    return %arg0, %c0_i32, %c0_i32_0 : i32, i32, i32
  }
}

</mosaic_0001>

<bundles_post_ra>
// kernel: tpu_custom_call.1
= control target key start
LH: loop header
LB: loop body
LE: loop exit
PB: predicated region body
PF: predicated region fallthrough
CT: control target
= control target key end

     0   :  { %s242_s0 = inlined_call_operand.vmem [shape: f32[16,128], index: 0, kind: input, shape index: {}]   ;;  %s243_s1 = inlined_call_operand.vmem [shape: s32[16,1], index: 1, kind: input, shape index: {}]   ;;  %s244_s2 = inlined_call_operand.hbm [shape: f32[1,8,128], index: 2, kind: output, shape index: {}]  }
   0x1   :  { %v23_v0 = vld [vmem:[%s242_s0] sm:$0xff] }
   0x2   :  { %7 = vsyncpa [#allocation6], 0  ;;  %34 = vmax.xlane.f32.xlu0 %v23_v0  ;;  %v24_v1 = vld [vmem:[%s242_s0 + $0x8] sm:$0xff]  ;;  %vm16_vm0 = vcmask 7168   ;;  %v185_v2 = vmov -inf   ;;  %v186_v3 = vmov 0   ;;  %v28_v15 = vlaneseq }
   0x3   :  { %17 = vst.msk [vmem:[#allocation2] sm:$0xff] %vm16_vm0, %v185_v2  ;;  %18 = vst.msk [vmem:[#allocation2 + $0x8] sm:$0xff] %vm16_vm0, %v185_v2  ;;  %147 = vset.pattern.permute.xlu1 %v186_v3  ;;  %148 = vset.pattern.permute.xlu0 %v186_v3  ;;  %v187_v4 = vmov 0.0   ;;  %v25_v5 = vld [vmem:[%s243_s1] sm:$0xff]  ;;  %v26_v14 = vld [vmem:[%s243_s1 + $0x8] sm:$0xff]  ;;  %s188_s1 = smov [#allocation5]  }
   0x4   :  { %19 = vst.msk [vmem:[#allocation3] sm:$0xff] %vm16_vm0, %v187_v4  ;;  %20 = vst.msk [vmem:[#allocation3 + $0x8] sm:$0xff] %vm16_vm0, %v187_v4  ;;  %v29_v16 = vand.u32 127, %v28_v15  ;;  %s135_s16 = sshll.u32 %s188_s1, 4  ;;  %s136_s16 = int_to_ptr.vmem [resolvable:$true] %s135_s16 }
   0x5   :  { %21 = vst.msk [vmem:[#allocation4] sm:$0xff] %vm16_vm0, %v187_v4  ;;  %22 = vst.msk [vmem:[#allocation4 + $0x8] sm:$0xff] %vm16_vm0, %v187_v4  ;;  %s161_s17 = scalar_lea.vmem %s136_s16, 128  ;;  %p166_p1 = scmp.lt.s32.totalorder %s136_s16, %s136_s16 }
   0x6   :  { %36 = vmax.xlane.f32.xlu0 %v24_v1  ;;  %p162_p0 = scmp.ne.s32.totalorder %s136_s16, %s161_s17  ;;  %p167_p2 = scmp.lt.s32.totalorder %s161_s17, %s161_s17 }
   0x8   :  { %p168_p3 = por %p167_p2, %p166_p1 }
   0xa   :  { %v32_v6 = vld [vmem:[#allocation2] sm:$0xff]  ;;  %v33_v9 = vld [vmem:[#allocation2 + $0x8] sm:$0xff]  ;;  %p169_p4 = pnand %p168_p3, %p162_p0 }
   0xb   :  { %v58_v35 = vld [vmem:[#allocation3] sm:$0xff]  ;;  %v59_v39 = vld [vmem:[#allocation3 + $0x8] sm:$0xff] }
   0xc   :  { %v77_v30 = vld [vmem:[#allocation4] sm:$0xff]  ;;  %v78_v44 = vld [vmem:[#allocation4 + $0x8] sm:$0xff] }
  0x1c   :  { %80 = vperm.xlu0 %148, %v25_v5  }
  0x8f   :  { %v35_v7 = vpop.xlane.xlu0 %34 }
  0x90   :  { %v38_v8 = vmax.f32 %v32_v6, %v35_v7 }
  0x92   :  { %v40_v10 = vsub.f32 %v32_v6, %v38_v8  ;;  %75 = vst.msk [vmem:[#allocation2] sm:$0xff] %vm16_vm0, %v38_v8  ;;  %48 = vperm.xlu1 %147, %v38_v8  }
  0x93   :  { %v37_v11 = vpop.xlane.xlu0 %36 }
  0x94   :  { %v39_v12 = vmax.f32 %v33_v9, %v37_v11  ;;  %v42_v32 = vmul.f32 1.442695, %v40_v10 }
  0x96   :  { %v41_v13 = vsub.f32 %v33_v9, %v39_v12  ;;  %76 = vst.msk [vmem:[#allocation2 + $0x8] sm:$0xff] %vm16_vm0, %v39_v12  ;;  %53 = vperm.xlu1 %147, %v39_v12  }
  0x98   :  { %v44_v33 = vmul.f32 1.442695, %v41_v13 }
  0x99   :  { %v100_v51 = vld [vmem:[#allocation2] sm:$0xff] }
  0x9a   :  { %83 = vperm.xlu1 %147, %v26_v14  }
  0x9b   :  { %v81_v17 = vpop.permute.xlu0 %80 }
  0x9c   :  { %vm85_vm1 = vcmp.eq.s32.totalorder %v29_v16, %v81_v17 }
  0x9d   :  { %v87_v18 = vsel %vm85_vm1, %v23_v0, 0.0  ;;  %v101_v56 = vld [vmem:[#allocation2 + $0x8] sm:$0xff] }
  0x9e   :  { %89 = vadd.xlane.f32.xlu0 %v87_v18 }
 0x111   :  { %v49_v19 = vpop.permute.xlu1 %48 }
 0x112   :  { %v56_v20 = vsub.f32 %v23_v0, %v49_v19 }
 0x114   :  { %v62_v21 = vmul.f32 1.442695, %v56_v20 }
 0x115   :  { %v54_v22 = vpop.permute.xlu1 %53 }
 0x116   :  { %149 = vpow2.f32 %v62_v21  ;;  %v57_v23 = vsub.f32 %v24_v1, %v54_v22 }
 0x118   :  { %v64_v24 = vmul.f32 1.442695, %v57_v23 }
 0x119   :  { %v84_v26 = vpop.permute.xlu1 %83 }
 0x11a   :  { %151 = vpow2.f32 %v64_v24  ;;  %vm86_vm2 = vcmp.eq.s32.totalorder %v29_v16, %v84_v26 }
 0x11b   :  { %v88_v28 = vsel %vm86_vm2, %v24_v1, 0.0  ;;  %153 = vpow2.f32 %v42_v32 }
 0x11c   :  { %155 = vpow2.f32 %v44_v33 }
 0x120   :  { %v150_v25 = vpop.eup %149 }
 0x121   :  { %66 = vadd.xlane.f32.xlu1 %v150_v25 }
 0x124   :  { %v152_v27 = vpop.eup %151 }
 0x125   :  { %68 = vadd.xlane.f32.xlu1 %v152_v27  ;;  %v154_v34 = vpop.eup %153 }
 0x126   :  { %v60_v36 = vmul.f32 %v154_v34, %v58_v35  ;;  %v156_v37 = vpop.eup %155 }
 0x127   :  { %v61_v41 = vmul.f32 %v156_v37, %v59_v39 }
 0x129   :  { %91 = vadd.xlane.f32.xlu1 %v88_v28 }
 0x12b   :  { %v90_v29 = vpop.xlane.xlu0 %89 }
 0x12c   :  { %v93_v31 = vadd.f32 %v90_v29, %v77_v30 }
 0x12e   :  { %95 = vst.msk [vmem:[#allocation4] sm:$0xff] %vm16_vm0, %v93_v31 }
 0x135   :  { %v110_v54 = vld [vmem:[#allocation4] sm:$0xff] }
 0x1ae   :  { %v67_v38 = vpop.xlane.xlu1 %66 }
 0x1af   :  { %v70_v40 = vadd.f32 %v67_v38, %v60_v36 }
 0x1b1   :  { %73 = vst.msk [vmem:[#allocation3] sm:$0xff] %vm16_vm0, %v70_v40 }
 0x1b2   :  { %v69_v42 = vpop.xlane.xlu1 %68 }
 0x1b3   :  { %v71_v43 = vadd.f32 %v69_v42, %v61_v41 }
 0x1b5   :  { %74 = vst.msk [vmem:[#allocation3 + $0x8] sm:$0xff] %vm16_vm0, %v71_v43 }
 0x1b6   :  { %v92_v45 = vpop.xlane.xlu1 %91 }
 0x1b7   :  { %v94_v46 = vadd.f32 %v92_v45, %v78_v44 }
 0x1b8   :  { %v102_v47 = vld [vmem:[#allocation3] sm:$0xff] }
 0x1b9   :  { %96 = vst.msk [vmem:[#allocation4 + $0x8] sm:$0xff] %vm16_vm0, %v94_v46  ;;  %157 = vlog2.f32 %v102_v47 }
 0x1bc   :  { %v103_v48 = vld [vmem:[#allocation3 + $0x8] sm:$0xff] }
 0x1bd   :  { %159 = vlog2.f32 %v103_v48 }
 0x1c0   :  { %v111_v59 = vld [vmem:[#allocation4 + $0x8] sm:$0xff] }
 0x1c3   :  { %v158_v49 = vpop.eup %157 }
 0x1c4   :  { %v105_v50 = vmul.f32 0.6931472, %v158_v49 }
 0x1c6   :  { %v108_v52 = vadd.f32 %v105_v50, %v100_v51 }
 0x1c7   :  { %v160_v53 = vpop.eup %159 }
 0x1c8   :  { %v107_v55 = vmul.f32 0.6931472, %v160_v53  ;;  %v112_v58 = vsub.f32 %v108_v52, %v110_v54 }
 0x1ca   :  { %v109_v57 = vadd.f32 %v107_v55, %v101_v56  ;;  %v114_v61 = vsel %vm16_vm0, %v112_v58, 0.0 }
 0x1cc   :  { %v113_v60 = vsub.f32 %v109_v57, %v111_v59 }
 0x1ce   :  { %v115_v62 = vsel %vm16_vm0, %v113_v60, 0.0 }
 0x1cf   :  { %v116_v63 = vadd.f32 %v115_v62, %v114_v61 }
 0x1d1   :  { %v117_v0 = vrot.slane %v116_v63, 4 }
 0x1d3   :  { %v118_v1 = vadd.f32 %v117_v0, %v116_v63 }
 0x1d5   :  { %v119_v2 = vrot.slane %v118_v1, 2 }
 0x1d7   :  { %v120_v3 = vadd.f32 %v119_v2, %v118_v1 }
 0x1d9   :  { %v121_v4 = vrot.slane %v120_v3, 1 }
 0x1db   :  { %v122_v5 = vadd.f32 %v121_v4, %v120_v3 }
 0x1dd   :  { %125 = vperm.xlu1 %147, %v122_v5  }
 0x25c   :  { %v126_v6 = vpop.permute.xlu1 %125 }
 0x25d   :  { %128 = vst [vmem:[#allocation5] sm:$0xff] %v126_v6 }
 0x25e   :  { %172 = shalt.err (!%p169_p4)
}
 0x25f   :  { %s173_s20 = scalar_lea.hbm %s244_s2, 128 }
 0x260   :  { %p174_p5 = scmp.ne.s32.totalorder %s244_s2, %s173_s20  ;;  %p177_p6 = scmp.lt.u32.totalorder %s173_s20, %s244_s2 }
 0x262   :  { %p179_p7 = pnand %p177_p6, %p174_p5 }
 0x264   :  { %182 = shalt.err (!%p179_p7)
}
 0x265   :  { %138 = dma.vmem_to_hbm [thread:$0]  %s136_s16, 128, %s244_s2, [#allocation6]  }
 0x266   :  { %183 = dma.done.wait [#allocation6], 128  }
 0x267   :  { %184 = vsyncadd [#allocation6], 4294967168 }
 0x268   :  { %142 = vsyncpa [#allocation6], 1 }

</bundles_post_ra>
